<compile_context>
chip_gen: v5e
topology: v5e:2x2
jax: 0.10.0
libtpu: 0.0.40
codegen_flags: <defaults>
</compile_context>

<pallas_src>
import functools

import jax
import jax.numpy as jnp
from jax.experimental import pallas as pl
from jax.experimental.pallas import tpu as pltpu


# ----------------------------------------------------------------------------
# ada_hermite-style builder: orthonormal Hermite function system Phi(params).
# params = [dilation, translation] (vp_layer default init is [0.1, 0.0]).
# Only phi is needed for the forward pass.
# TODO(synk): dphi and the index matrix `ind` (used only in vpfun.backward / the
#             penalty term) are not constructed here; this is forward-only.
# ----------------------------------------------------------------------------
def ada_hermite_phi(n_in, n_out, params, dtype=jnp.float32):
    dilation = params[0].astype(dtype)
    translation = params[1].astype(dtype)
    t = dilation * (jnp.arange(n_in, dtype=dtype) - n_in / 2.0 - translation)
    cols = []
    h0 = (jnp.pi ** -0.25) * jnp.exp(-0.5 * t * t)
    cols.append(h0)
    if n_out > 1:
        cols.append(jnp.sqrt(2.0).astype(dtype) * t * h0)
    for k in range(2, n_out):
        hk = (jnp.sqrt(2.0 / k) * t * cols[k - 1]
              - jnp.sqrt((k - 1) / k) * cols[k - 2])
        cols.append(hk.astype(dtype))
    phi = jnp.stack(cols[:n_out], axis=1).astype(dtype)          # (n_in, n_out)
    phi = phi * jnp.sqrt(jnp.abs(dilation)).astype(dtype)        # dilation normalization
    return phi


# ----------------------------------------------------------------------------
# Pallas kernel: one lane-dense row-tile of the projection matmul on the MXU.
#   x_ref : (TM, Lp)   row tile of the flattened input (VMEM)
#   w_ref : (Lp, Kp)   pinv(phi)^T, zero-padded; constant block for every step
#   o_ref : (TM, Kp)   output coefficient tile
# ----------------------------------------------------------------------------
def vp_coeffs_kernel(x_ref, w_ref, o_ref):
    o_ref[...] = jnp.dot(
        x_ref[...], w_ref[...], preferred_element_type=jnp.float32
    ).astype(o_ref.dtype)


def _round_up(x, m):
    return ((x + m - 1) // m) * m


def _choose_tm(m_rows, lp, kp, itemsize, budget_bytes=12 << 20):
    """Row-tile size: biggest multiple of 8 whose double-buffered x/out tiles fit
    a conservative VMEM budget (safe on v5e 16 MiB / v6e 32 MiB / v7x 32 MiB scoped)."""
    per_row = 2 * (lp + kp) * itemsize           # double-buffered input + output rows
    tm = max(8, budget_bytes // max(per_row, 1))
    tm = min(tm, 1024)                           # diminishing returns past ~512-1024 rows
    tm = min(tm, _round_up(m_rows, 8))           # never larger than the (padded) problem
    return max(8, (tm // 8) * 8)


def vp_layer_forward(x, params, n_in, n_out, penalty=0.0,
                     use_pallas=None, compute_dtype=None):
    """JAX/Pallas equivalent of vp_layer.forward (forward pass of vpfun)."""
    del penalty  # penalty only affects the training loss / backward pass
    N, C, L = x.shape
    assert L == n_in
    K = n_out
    out_dtype = x.dtype

    # --- glue: build Phi and its pseudo-inverse in float32 for robustness -------
    phi32 = ada_hermite_phi(n_in, n_out, params, dtype=jnp.float32)   # (L, K)
    w32 = jnp.transpose(jnp.linalg.pinv(phi32))                       # (L, K)

    cdtype = jnp.dtype(compute_dtype) if compute_dtype is not None else jnp.dtype(out_dtype)

    M = N * C
    # Cheap dispatch: at toy sizes the pallas_call launch costs more than the matmul.
    if use_pallas is None:
        use_pallas = (M * L * K) >= (1 << 18)
    if not use_pallas:
        out = jnp.einsum("ncl,lk->nck",
                         x.astype(jnp.float32), w32).astype(out_dtype)
        return out

    # --- Pallas path: flattened, padded, row-tiled projection matmul ------------
    x2 = x.astype(cdtype).reshape(M, L)
    w = w32.astype(cdtype)

    Lp = _round_up(L, 128)                       # lane-aligned contraction dim
    Kp = _round_up(K, 128)                       # lane-dense output (unmasked vst)
    itemsize = jnp.dtype(cdtype).itemsize
    TM = _choose_tm(M, Lp, Kp, itemsize)
    Mp = _round_up(M, TM)

    if (Mp != M) or (Lp != L):
        x2 = jnp.pad(x2, ((0, Mp - M), (0, Lp - L)))
    if (Lp != L) or (Kp != K):
        w = jnp.pad(w, ((0, Lp - L), (0, Kp - K)))

    grid = (Mp // TM,)
    flops = 2 * Mp * Lp * Kp
    bytes_accessed = (Mp * Lp + Lp * Kp + Mp * Kp) * itemsize

    out_padded = pl.pallas_call(
        vp_coeffs_kernel,
        out_shape=jax.ShapeDtypeStruct((Mp, Kp), cdtype),
        grid_spec=pltpu.PrefetchScalarGridSpec(
            num_scalar_prefetch=0,
            grid=grid,
            in_specs=[
                pl.BlockSpec((TM, Lp), lambda i: (i, 0)),
                pl.BlockSpec((Lp, Kp), lambda i: (0, 0)),  # constant block: weight stays resident
            ],
            out_specs=pl.BlockSpec((TM, Kp), lambda i: (i, 0)),
        ),
        compiler_params=pltpu.CompilerParams(
            dimension_semantics=("parallel",),   # lets v7x's 2 TCs split the row tiles
            vmem_limit_bytes=32 << 20,
        ),
        cost_estimate=pl.CostEstimate(
            flops=flops, transcendentals=0, bytes_accessed=bytes_accessed),
    )(x2, w)

    out = out_padded[:M, :K].astype(out_dtype).reshape(N, C, K)
    return out


if __name__ == "__main__":
    # Small shapes consistent with the module: x is (N, C, L=n_in), output (N, C, n_out)
    N, C = 2, 4
    n_in, n_out = 16, 8

    key = jax.random.PRNGKey(0)
    x = jax.random.normal(key, (N, C, n_in), dtype=jnp.float32)

    # Deterministic parameter init, matching vp_layer default init=[0.1, 0.0]
    params = jnp.array([0.1, 0.0], dtype=jnp.float32)

    # Force the Pallas path so the kernel itself is exercised even at toy size.
    fwd = functools.partial(vp_layer_forward, n_in=n_in, n_out=n_out,
                            penalty=0.0, use_pallas=True)
    out = jax.block_until_ready(fwd(x, params))

    # Reference check (pure JAX) of the forward semantics
    phi_ref = ada_hermite_phi(n_in, n_out, params, dtype=jnp.float32)
    phip_ref = jnp.linalg.pinv(phi_ref)
    ref = jnp.transpose(phip_ref @ jnp.transpose(x, (0, 2, 1)), (0, 2, 1))

    assert out.shape == (N, C, n_out)
    assert jnp.allclose(out, ref, atol=1e-4, rtol=1e-4)

    print("KERNEL_OK")
</pallas_src>

<mosaic_0001>
module attributes {stable_mosaic.version = 11 : i64} {
  func.func @vp_coeffs_kernel(%arg0: i32, %arg1: memref<8x128xf32, #tpu.memory_space<vmem>>, %arg2: memref<128x128xf32, #tpu.memory_space<vmem>>, %arg3: memref<8x128xf32, #tpu.memory_space<vmem>>) attributes {dimension_semantics = [#tpu.dimension_semantics<parallel>], iteration_bounds = array<i64: 1>, scalar_prefetch = 0 : i64, scratch_operands = 0 : i64, tpu.core_type = #tpu.core_type<tc>, window_params = [{transform_indices = @transform_0, window_bounds = array<i64: 8, 128>}, {pipeline_mode = #tpu.pipeline_mode<synchronous>, transform_indices = @transform_1, window_bounds = array<i64: 128, 128>}, {transform_indices = @transform_2, window_bounds = array<i64: 8, 128>}]} {
    %c0 = arith.constant 0 : index
    %c0_0 = arith.constant 0 : index
    %0 = vector.load %arg1[%c0, %c0_0] : memref<8x128xf32, #tpu.memory_space<vmem>>, vector<8x128xf32>
    %c0_1 = arith.constant 0 : index
    %c0_2 = arith.constant 0 : index
    %1 = vector.load %arg2[%c0_1, %c0_2] : memref<128x128xf32, #tpu.memory_space<vmem>>, vector<128x128xf32>
    %cst = arith.constant dense<0.000000e+00> : vector<8x128xf32>
    %2 = tpu.matmul %0, %1, %cst {dimension_numbers = #tpu.dot_dimension_numbers<[1], [0], [0], [1], [0, 0, 1, 1], [], []>} : vector<8x128xf32>, vector<128x128xf32>, vector<8x128xf32> -> vector<8x128xf32>
    %c0_3 = arith.constant 0 : index
    %c0_4 = arith.constant 0 : index
    %3 = vector.load %arg3[%c0_3, %c0_4] : memref<8x128xf32, #tpu.memory_space<vmem>>, vector<8x128xf32>
    tpu.vector_store %arg3[%c0_3, %c0_4], %2 {strides = array<i32>} : memref<8x128xf32, #tpu.memory_space<vmem>>, vector<8x128xf32>,
    return
  }
  func.func @transform_0(%arg0: i32) -> (i32, i32) {
    %c0_i32 = arith.constant 0 : i32
    %c0_i32_0 = arith.constant 0 : i32
    return %arg0, %c0_i32 : i32, i32
  }
  func.func @transform_1(%arg0: i32) -> (i32, i32) {
    %c0_i32 = arith.constant 0 : i32
    %c0_i32_0 = arith.constant 0 : i32
    %c0_i32_1 = arith.constant 0 : i32
    return %c0_i32, %c0_i32_0 : i32, i32
  }
  func.func @transform_2(%arg0: i32) -> (i32, i32) {
    %c0_i32 = arith.constant 0 : i32
    %c0_i32_0 = arith.constant 0 : i32
    return %arg0, %c0_i32 : i32, i32
  }
}

</mosaic_0001>

<bundles_post_ra>
// kernel: tpu_custom_call.1
= control target key start
LH: loop header
LB: loop body
LE: loop exit
PB: predicated region body
PF: predicated region fallthrough
CT: control target
= control target key end

     0   :  { %7 = vsyncpa [#allocation3], 0  ;;  %s210_s0 = inlined_call_operand.hbm [shape: f32[8,128], index: 0, kind: input, shape index: {}]   ;;  %s211_s1 = inlined_call_operand.hbm [shape: f32[128,128], index: 1, kind: input, shape index: {}]   ;;  %s212_s2 = inlined_call_operand.hbm [shape: f32[8,128], index: 2, kind: output, shape index: {}]  }
   0x1   :  { %8 = vsyncpa [#allocation6], 0 }
   0x2   :  { %9 = vsyncpa [#allocation4], 0  ;;  %s15_s11 = sshll.u32 %s210_s0, 4  ;;  %s181_s12 = smov [#allocation2]   ;;  %s16_s11 = int_to_ptr.hbm [resolvable:$true] %s15_s11 }
   0x3   :  { %s17_s13 = sshll.u32 %s181_s12, 4  ;;  %s25_s16 = sshll.u32 %s211_s1, 4  ;;  %s18_s13 = int_to_ptr.vmem [resolvable:$true] %s17_s13  ;;  %s26_s16 = int_to_ptr.hbm [resolvable:$true] %s25_s16 }
   0x4   :  { %20 = dma.hbm_to_vmem [thread:$0]  %s16_s11, 128, %s18_s13, [#allocation3]  }
   0x5   :  { %s182_s17 = smov [#allocation5]   ;;  %s183_s19 = smov 128  }
   0x6   :  { %s27_s18 = sshll.u32 %s182_s17, 4  ;;  %s184_s20 = smov 8   ;;  %s28_s18 = int_to_ptr.vmem [resolvable:$true] %s27_s18 }
   0x7   :  { %33 = dma.hbm_to_vmem [thread:$0]  %s26_s16, 2048, %s28_s18, [#allocation6], %s183_s19, %s183_s19, %s184_s20  }
   0x8   :  { %175 = dma.done.wait [#allocation3], 128  }
   0x9   :  { %176 = vsyncadd [#allocation3], 4294967168 }
   0xa   :  { %177 = dma.done.wait [#allocation6], 2048  }
   0xb   :  { %178 = vsyncadd [#allocation6], 4294965248  ;;  %v58_v0 = vld [vmem:[#allocation5 + $0x78] sm:$0xff]  ;;  %v57_v1 = vld [vmem:[#allocation5 + $0x70] sm:$0xff]  ;;  %s185_s0 = smov [#allocation7]   ;;  %s87_s23 = sshll.u32 %s212_s2, 4  ;;  %s88_s23 = int_to_ptr.hbm [resolvable:$true] %s87_s23 }
   0xc   :  { %59 = vmatpush.msra.mxu0 %v58_v0  ;;  %v56_v2 = vld [vmem:[#allocation5 + $0x68] sm:$0xff]  ;;  %v55_v3 = vld [vmem:[#allocation5 + $0x60] sm:$0xff]  ;;  %v54_v4 = vld [vmem:[#allocation5 + $0x58] sm:$0xff]  ;;  %s85_s1 = sshll.u32 %s185_s0, 4  ;;  %s86_s1 = int_to_ptr.vmem [resolvable:$true] %s85_s1 }
   0xd   :  { %v53_v5 = vld [vmem:[#allocation5 + $0x50] sm:$0xff]  ;;  %v52_v6 = vld [vmem:[#allocation5 + $0x48] sm:$0xff]  ;;  %v51_v7 = vld [vmem:[#allocation5 + $0x40] sm:$0xff] }
   0xe   :  { %60 = vmatpush.msra.mxu0 %v57_v1  ;;  %v50_v8 = vld [vmem:[#allocation5 + $0x38] sm:$0xff]  ;;  %v49_v9 = vld [vmem:[#allocation5 + $0x30] sm:$0xff]  ;;  %v48_v10 = vld [vmem:[#allocation5 + $0x28] sm:$0xff] }
   0xf   :  { %v47_v11 = vld [vmem:[#allocation5 + $0x20] sm:$0xff]  ;;  %v46_v12 = vld [vmem:[#allocation5 + $0x18] sm:$0xff]  ;;  %v45_v13 = vld [vmem:[#allocation5 + $0x10] sm:$0xff] }
  0x10   :  { %61 = vmatpush.msra.mxu0 %v56_v2  ;;  %v44_v14 = vld [vmem:[#allocation5 + $0x8] sm:$0xff]  ;;  %v43_v15 = vld [vmem:[#allocation5] sm:$0xff]  ;;  %v42_v16 = vld [vmem:[#allocation2] sm:$0xff] }
  0x12   :  { %62 = vmatpush.msra.mxu0 %v55_v3 }
  0x14   :  { %63 = vmatpush.msra.mxu0 %v54_v4 }
  0x16   :  { %64 = vmatpush.msra.mxu0 %v53_v5 }
  0x18   :  { %65 = vmatpush.msra.mxu0 %v52_v6 }
  0x1a   :  { %66 = vmatpush.msra.mxu0 %v51_v7 }
  0x1c   :  { %67 = vmatpush.msra.mxu0 %v50_v8 }
  0x1e   :  { %68 = vmatpush.msra.mxu0 %v49_v9 }
  0x20   :  { %69 = vmatpush.msra.mxu0 %v48_v10 }
  0x22   :  { %70 = vmatpush.msra.mxu0 %v47_v11 }
  0x24   :  { %71 = vmatpush.msra.mxu0 %v46_v12 }
  0x26   :  { %72 = vmatpush.msra.mxu0 %v45_v13 }
  0x28   :  { %73 = vmatpush.msra.mxu0 %v44_v14 }
  0x2a   :  { %74 = vmatpush.msra.mxu0 %v43_v15 }
  0x2b   :  { %75 = vmatmul.f32.vlgmr.msra.gmra.mxu0 %v42_v16 }
  0xa8   :  { %v76_v17 = vpop.f32.mrf.mxu0 }
  0xa9   :  { %79 = vst [vmem:[#allocation7] sm:$0xff] %v76_v17 }
  0xaa   :  { %90 = dma.vmem_to_hbm [thread:$0]  %s86_s1, 128, %s88_s23, [#allocation4]  }
  0xab   :  { %179 = dma.done.wait [#allocation4], 128  }
  0xac   :  { %180 = vsyncadd [#allocation4], 4294967168 }
  0xad   :  { %95 = vsyncpa [#allocation3], 1 }
  0xae   :  { %96 = vsyncpa [#allocation6], 1 }
  0xaf   :  { %97 = vsyncpa [#allocation4], 1 }

</bundles_post_ra>
